<compile_context>
chip_gen: v7x
topology: tpu7x:2x2x1
jax: 0.10.0
libtpu: 0.0.40
codegen_flags: <defaults>
</compile_context>

<pallas_src>
import jax
import jax.numpy as jnp
from jax.experimental import pallas as pl
from jax.experimental.pallas import tpu as pltpu


def fused_forward_kernel(x_ref, inp_ref, wc_ref, w2t_ref, bc_ref, out_ref):
    # Two independent small matmuls (no data dependence between them) plus a
    # VPU bias add; all operands live fully in VMEM (single padded vregs).
    out_ref[...] = (
        jnp.dot(x_ref[...], wc_ref[...], preferred_element_type=jnp.float32)
        + jnp.dot(inp_ref[...], w2t_ref[...], preferred_element_type=jnp.float32)
        + bc_ref[...]
    )


def precompute_fused_params(w1_t, b1, w2_t, b2):
    """Parameter-only algebra, executed once at init time (cached thereafter).

    (x @ W1^T + b1 + inp) @ W2^T + b2
        = x @ (W1^T @ W2^T) + inp @ W2^T + (b1 @ W2^T + b2)
    """
    wc = w1_t @ w2_t                       # (2, 4)
    bc = (b1 @ w2_t + b2).reshape(1, -1)   # (1, 4)
    return wc, bc


@jax.jit
def model_forward(x, inp, wc, w2_t, bc):
    rows = x.shape[0]
    n_out = w2_t.shape[1]
    cost = pl.CostEstimate(
        flops=2 * rows * (x.shape[1] + inp.shape[1]) * n_out + rows * n_out,
        transcendentals=0,
        bytes_accessed=4 * (x.size + inp.size + wc.size + w2_t.size + bc.size
                            + rows * n_out),
    )

    # TODO(synk): the original forward applies self.linear2 (Linear(3,4)) a
    # second time to v2 (which already has 4 features) — a shape error even in
    # PyTorch; that ill-typed application is omitted and v2 is returned.
    return pl.pallas_call(
        fused_forward_kernel,
        out_shape=jax.ShapeDtypeStruct((rows, n_out), jnp.float32),
        in_specs=[pl.BlockSpec(memory_space=pltpu.MemorySpace.VMEM)] * 5,
        out_specs=pl.BlockSpec(memory_space=pltpu.MemorySpace.VMEM),
        cost_estimate=cost,
    )(x, inp, wc, w2_t, bc)


def _reference(x, inp, w1_t, b1, w2_t, b2):
    v1 = x @ w1_t + b1 + inp
    v2 = v1 @ w2_t + b2
    return v2


if __name__ == "__main__":
    key = jax.random.PRNGKey(0)
    k_x, k_inp, k_w1, k_b1, k_w2, k_b2 = jax.random.split(key, 6)

    # x: (3, 2).  NOTE: the original script creates inp as (3, 2), which does
    # not broadcast against linear1(x) of shape (3, 3); we use (3, 3) so the
    # add is well-formed.
    x = jax.random.normal(k_x, (3, 2), dtype=jnp.float32)
    inp = jax.random.normal(k_inp, (3, 3), dtype=jnp.float32)

    # Deterministic parameter init (PyTorch Linear: U(-1/sqrt(fan_in), ...)).
    # Stored transposed: [in_features, out_features].
    w1_t = jax.random.uniform(k_w1, (2, 3), jnp.float32, -1.0 / 2**0.5, 1.0 / 2**0.5)
    b1 = jax.random.uniform(k_b1, (3,), jnp.float32, -1.0 / 2**0.5, 1.0 / 2**0.5)
    w2_t = jax.random.uniform(k_w2, (3, 4), jnp.float32, -1.0 / 3**0.5, 1.0 / 3**0.5)
    b2 = jax.random.uniform(k_b2, (4,), jnp.float32, -1.0 / 3**0.5, 1.0 / 3**0.5)

    # Parameter-only fusion, computed once (outside the per-call jit path).
    wc, bc = precompute_fused_params(w1_t, b1, w2_t, b2)
    wc = jax.block_until_ready(wc)
    bc = jax.block_until_ready(bc)

    out = model_forward(x, inp, wc, w2_t, bc)
    out = jax.block_until_ready(out)

    ref = _reference(x, inp, w1_t, b1, w2_t, b2)
    assert out.shape == (3, 4), out.shape
    assert jnp.allclose(out, ref, atol=1e-5, rtol=1e-5), (out, ref)

    print("KERNEL_OK")
</pallas_src>

<mosaic_0001>
module attributes {stable_mosaic.version = 11 : i64} {
  func.func @fused_forward_kernel(%arg0: memref<3x2xf32, #tpu.memory_space<vmem>>, %arg1: memref<3x3xf32, #tpu.memory_space<vmem>>, %arg2: memref<2x4xf32, #tpu.memory_space<vmem>>, %arg3: memref<3x4xf32, #tpu.memory_space<vmem>>, %arg4: memref<1x4xf32, #tpu.memory_space<vmem>>, %arg5: memref<3x4xf32, #tpu.memory_space<vmem>>) attributes {dimension_semantics = [], scalar_prefetch = 0 : i64, scratch_operands = 0 : i64, tpu.core_type = #tpu.core_type<tc>} {
    %c0 = arith.constant 0 : index
    %c0_0 = arith.constant 0 : index
    %0 = vector.load %arg0[%c0, %c0_0] : memref<3x2xf32, #tpu.memory_space<vmem>>, vector<3x2xf32>
    %c0_1 = arith.constant 0 : index
    %c0_2 = arith.constant 0 : index
    %1 = vector.load %arg2[%c0_1, %c0_2] : memref<2x4xf32, #tpu.memory_space<vmem>>, vector<2x4xf32>
    %cst = arith.constant dense<0.000000e+00> : vector<3x4xf32>
    %2 = tpu.matmul %0, %1, %cst {dimension_numbers = #tpu.dot_dimension_numbers<[1], [0], [0], [1], [0, 0, 1, 1], [], []>} : vector<3x2xf32>, vector<2x4xf32>, vector<3x4xf32> -> vector<3x4xf32>
    %c0_3 = arith.constant 0 : index
    %c0_4 = arith.constant 0 : index
    %3 = vector.load %arg1[%c0_3, %c0_4] : memref<3x3xf32, #tpu.memory_space<vmem>>, vector<3x3xf32>
    %c0_5 = arith.constant 0 : index
    %c0_6 = arith.constant 0 : index
    %4 = vector.load %arg3[%c0_5, %c0_6] : memref<3x4xf32, #tpu.memory_space<vmem>>, vector<3x4xf32>
    %cst_7 = arith.constant dense<0.000000e+00> : vector<3x4xf32>
    %5 = tpu.matmul %3, %4, %cst_7 {dimension_numbers = #tpu.dot_dimension_numbers<[1], [0], [0], [1], [0, 0, 1, 1], [], []>} : vector<3x3xf32>, vector<3x4xf32>, vector<3x4xf32> -> vector<3x4xf32>
    %6 = arith.addf %2, %5 : vector<3x4xf32>
    %c0_8 = arith.constant 0 : index
    %c0_9 = arith.constant 0 : index
    %7 = vector.load %arg4[%c0_8, %c0_9] : memref<1x4xf32, #tpu.memory_space<vmem>>, vector<1x4xf32>
    %8 = vector.broadcast %7 : vector<1x4xf32> to vector<3x4xf32>
    %9 = arith.addf %6, %8 : vector<3x4xf32>
    %c0_10 = arith.constant 0 : index
    %c0_11 = arith.constant 0 : index
    %10 = vector.load %arg5[%c0_10, %c0_11] : memref<3x4xf32, #tpu.memory_space<vmem>>, vector<3x4xf32>
    tpu.vector_store %arg5[%c0_10, %c0_11], %9 {strides = array<i32>} : memref<3x4xf32, #tpu.memory_space<vmem>>, vector<3x4xf32>,
    return
  }
}

</mosaic_0001>

<bundles_post_ra>
// kernel: model_forward.1
= control target key start
LH: loop header
LB: loop body
LE: loop exit
PB: predicated region body
PF: predicated region fallthrough
CT: control target
= control target key end

     0   :  { %vm29_vm0 = vcmask 1042432   ;;  %vm107_vm1 = vcmask 1041408   ;;  %v251_v1 = vmov 0.0   ;;  %vm25_vm2 = vcmask 23552   ;;  %s311_s0 = inlined_call_operand.vmem [shape: f32[3,2], index: 0, kind: input, shape index: {}]   ;;  %s312_s1 = inlined_call_operand.vmem [shape: f32[3,3], index: 1, kind: input, shape index: {}]   ;;  %s313_s2 = inlined_call_operand.vmem [shape: f32[2,4], index: 2, kind: input, shape index: {}]   ;;  %s314_s3 = inlined_call_operand.vmem [shape: f32[3,4], index: 3, kind: input, shape index: {}]   ;;  %s315_s4 = inlined_call_operand.vmem [shape: f32[1,4], index: 4, kind: input, shape index: {}]   ;;  %s316_s5 = inlined_call_operand.hbm [shape: f32[3,4], index: 5, kind: output, shape index: {}]  }
   0x1   :  { %v24_v0 = vld [vmem:[%s314_s3] sm:$0x7]  ;;  %214 = vmatprep.subr.mxu0 %v251_v1  ;;  %219 = vmatprep.subr.mxu1 %v251_v1  ;;  %vm103_vm3 = vcmask 15360   ;;  %vm252_vm4 = vmmov 0  }
   0x2   :  { %v22_v2 = vld [vmem:[%s313_s2] sm:$0x3]  ;;  %215 = vmatpush3.msk.msra.mxu0 %vm29_vm0, %v24_v0  ;;  %216 = vmatprep.mubr.msk.f32.mxu0 %vm252_vm4, %v251_v1 }
   0x3   :  { %v23_v3 = vld [vmem:[%s312_s1] sm:$0x7] }
   0x4   :  { %v21_v4 = vld [vmem:[%s311_s0] sm:$0x7] }
   0x5   :  { %10 = vsyncpa [#allocation3], 0  ;;  %220 = vmatpush3.msk.msra.mxu1 %vm107_vm1, %v22_v2  ;;  %221 = vmatprep.mubr.msk.f32.mxu1 %vm252_vm4, %v251_v1  ;;  %v209_v7 = vld [vmem:[%s315_s4] ss:$0 sm:$0xff]  ;;  %s253_s1 = smov [#allocation2]   ;;  %vm189_vm5 = vcmask 26624  }
   0x6   :  { %217 = vmatmul.mubr.msk.f32.vlgmr.msra.gmra.mrb[0].mxu0 %vm25_vm2, %v23_v3  ;;  %222 = vmatmul.mubr.msk.f32.vlgmr.msra.gmra.mrb[0].mxu1 %vm103_vm3, %v21_v4  ;;  %s197_s26 = sshll.u32 %s253_s1, 4  ;;  %s198_s26 = int_to_ptr.vmem [resolvable:$true] %s197_s26 }
   0x7   :  { %s227_s0 = scalar_lea.vmem %s198_s26, 64  ;;  %p232_p1 = scmp.lt.s32.totalorder %s198_s26, %s198_s26 }
   0x8   :  { %p228_p0 = scmp.ne.s32.totalorder %s198_s26, %s227_s0  ;;  %p233_p2 = scmp.lt.s32.totalorder %s227_s0, %s227_s0 }
   0xa   :  { %p234_p3 = por %p233_p2, %p232_p1 }
   0xc   :  { %p235_p4 = pnand %p234_p3, %p228_p0 }
  0xd9   :  { %v99_v5 = vpop.f32.mrb[0].mxu0  ;;  %v177_v6 = vpop.f32.mrb[0].mxu1 }
  0xda   :  { %v178_v8 = vadd.f32 %v177_v6, %v99_v5  ;;  %v218_v9 = vpop.f32.mrb[1].mxu0  ;;  %v223_v10 = vpop.f32.mrb[1].mxu1 }
  0xdc   :  { %v188_v11 = vadd.f32 %v209_v7, %v178_v8 }
  0xde   :  { %190 = vst.msk [vmem:[#allocation2] sm:$0x7] %vm189_vm5, %v188_v11 }
  0xdf   :  { %238 = shalt.err (!%p235_p4)
}
  0xe0   :  { %s239_s4 = scalar_lea.hbm %s316_s5, 64 }
  0xe1   :  { %p240_p5 = scmp.ne.s32.totalorder %s316_s5, %s239_s4  ;;  %p243_p6 = scmp.lt.u32.totalorder %s239_s4, %s316_s5 }
  0xe3   :  { %p245_p7 = pnand %p243_p6, %p240_p5 }
  0xe5   :  { %248 = shalt.err (!%p245_p7)
}
  0xe6   :  { %200 = dma.vmem_to_hbm [thread:$0]  %s198_s26, 64, %s316_s5, [#allocation3]  }
  0xe7   :  { %249 = dma.done.wait [#allocation3], 64  }
  0xe8   :  { %250 = vsyncadd [#allocation3], 4294967232 }
  0xe9   :  { %204 = vsyncpa [#allocation3], 1 }

</bundles_post_ra>
